<compile_context>
chip_gen: v6e
topology: v6e:2x2x1
jax: 0.10.0
libtpu: 0.0.40
codegen_flags: <defaults>
</compile_context>

<pallas_src>
import math

import jax
import jax.numpy as jnp
from jax import lax
from jax.experimental import pallas as pl
from jax.experimental.pallas import tpu as pltpu

LANES = 128
SUBLANES = 8
MAX_TR = 8192          # rows per block: 8192*128*4B = 4 MiB per f32 input block
_SENTINEL = -100.0     # finite pad logit: BCE term ~ exp(-100) ~ 0 (never -inf)


def _round_up(x: int, m: int) -> int:
    return ((x + m - 1) // m) * m


def _row_pack(dtype) -> int:
    # native sublane packing: (8,128) for 4-byte, (16,128) bf16/f16, (32,128) int8
    return max(8, 8 * (4 // jnp.dtype(dtype).itemsize))


def _bce_chunk_sum(out_ref, tgt_ref, tr, ch, valid_rows=None):
    """Sum of stable BCE-with-logits terms over a (tr, 128) block.

    Accumulates chunk-by-chunk (ch rows at a time) into a single (8,128) f32
    value so intermediates stay in vregs.  `valid_rows` (traced scalar) enables
    the row mask and is only passed on the edge block(s).
    """
    nch = tr // ch

    def body(j, acc):
        r0 = pl.multiple_of(j * ch, ch)
        x = out_ref[pl.ds(r0, ch), :].astype(jnp.float32)
        y = tgt_ref[pl.ds(r0, ch), :].astype(jnp.float32)
        # numerically stable: max(x,0) - x*y + log1p(exp(-|x|))
        t = jnp.maximum(x, 0.0) - x * y + jnp.log1p(jnp.exp(-jnp.abs(x)))
        if valid_rows is not None:
            ridx = lax.broadcasted_iota(jnp.int32, (ch, LANES), 0) + r0
            t = jnp.where(ridx < valid_rows, t, 0.0)
        return acc + t.reshape(ch // SUBLANES, SUBLANES, LANES).sum(axis=0)

    return lax.fori_loop(0, nch, body,
                         jnp.zeros((SUBLANES, LANES), jnp.float32),
                         unroll=min(nch, 8))


def _make_kernel(rows: int, tr: int, ch: int, steps: int):
    def kernel(out_ref, tgt_ref, acc_ref):
        c = pl.program_id(0)            # core / split index ("parallel")
        i = pl.program_id(1)            # reduction step     ("arbitrary")
        g = c * steps + i               # global row-block index

        @pl.when(i == 0)
        def _init():
            acc_ref[...] = jnp.zeros_like(acc_ref)

        is_edge = (g + 1) * tr > rows   # block extends past the valid rows

        @pl.when(jnp.logical_not(is_edge))
        def _steady():                  # fast path: no masking at all
            acc_ref[...] += _bce_chunk_sum(out_ref, tgt_ref, tr, ch)

        @pl.when(is_edge)
        def _edge():                    # partial / clamped block(s) only
            acc_ref[...] += _bce_chunk_sum(out_ref, tgt_ref, tr, ch,
                                           valid_rows=rows - g * tr)

    return kernel


def siamese_loss(out: jax.Array, tgt: jax.Array, *,
                 max_block_rows: int = MAX_TR) -> jax.Array:
    """BCEWithLogitsLoss(out, tgt), mean reduction (== nn.BCEWithLogitsLoss)."""
    assert out.shape == tgt.shape
    total = out.size
    assert total > 0

    rows = -(-total // LANES)                           # 128-wide rows needed
    row_align = max(_row_pack(out.dtype), _row_pack(tgt.dtype))

    if rows >= max_block_rows:
        tr = _round_up(max_block_rows, row_align)
    else:
        tr = _round_up(rows, row_align)
    ch = math.gcd(tr, 64)                               # chunk rows (in-vreg loop)

    nblocks = -(-rows // tr)
    nsplit = 2 if nblocks >= 2 else 1                   # 2-TC split (v7x); 1 otherwise
    steps = -(-nblocks // nsplit)

    num_pad = rows * LANES - total                      # < 128; 0 for aligned sizes

    def to2d(a, pad_val):
        flat = a.reshape(-1)                            # layout no-op, no copy
        if num_pad:
            # Rare lane-tail pad (total % 128 != 0): finite sentinel logit so the
            # padded elements contribute ~0 and the kernel needs no lane mask.
            flat = jnp.pad(flat, (0, num_pad), constant_values=pad_val)
        return flat.reshape(rows, LANES)

    out2d = to2d(out, _SENTINEL)
    tgt2d = to2d(tgt, 0)

    kernel = _make_kernel(rows, tr, ch, steps)

    # Clamp so the DMA window always overlaps the array (the all-out-of-range
    # steps that the clamp creates are fully masked by the edge path).
    idx_in = lambda c, i: (jnp.minimum(c * steps + i, nblocks - 1), 0)

    partials = pl.pallas_call(
        kernel,
        out_shape=jax.ShapeDtypeStruct((nsplit, SUBLANES, LANES), jnp.float32),
        grid_spec=pltpu.PrefetchScalarGridSpec(
            num_scalar_prefetch=0,
            grid=(nsplit, steps),
            in_specs=[
                pl.BlockSpec((tr, LANES), idx_in),
                pl.BlockSpec((tr, LANES), idx_in),
            ],
            # per-core resident (8,128) accumulator block (lane-dense output)
            out_specs=pl.BlockSpec((None, SUBLANES, LANES), lambda c, i: (c, 0, 0)),
        ),
        compiler_params=pltpu.CompilerParams(
            dimension_semantics=("parallel", "arbitrary"),
            vmem_limit_bytes=40 * 1024 * 1024,
        ),
        cost_estimate=pl.CostEstimate(
            flops=8 * total,
            transcendentals=2 * total,
            bytes_accessed=total * (out.dtype.itemsize + tgt.dtype.itemsize)
            + nsplit * SUBLANES * LANES * 4,
        ),
    )(out2d, tgt2d)

    return jnp.sum(partials) * (1.0 / total)


def siamese_loss_ref(out, tgt):
    x = out.astype(jnp.float32)
    y = tgt.astype(jnp.float32)
    term = jnp.maximum(x, 0.0) - x * y + jnp.log1p(jnp.exp(-jnp.abs(x)))
    return jnp.mean(term)


if __name__ == "__main__":
    key = jax.random.PRNGKey(0)

    def check(shape, **kw):
        k = jax.random.fold_in(key, hash(shape) % (2 ** 31))
        k1, k2 = jax.random.split(k)
        logits = jax.random.normal(k1, shape, dtype=jnp.float32)
        labels = (jax.random.uniform(k2, shape) > 0.5).astype(jnp.float32)
        got = jax.block_until_ready(siamese_loss(logits, labels, **kw))
        want = siamese_loss_ref(logits, labels)
        assert jnp.allclose(got, want, rtol=1e-5, atol=1e-6), (shape, got, want)

    # primary, spec-consistent siamese similarity-head shape (NCHW logits/targets)
    check((2, 4, 16, 16))
    # lane-misaligned size -> sentinel lane-tail pad + masked partial block
    check((3, 5, 7, 11))
    # multi-block + 2-way parallel split + steady/edge paths (small via max_block_rows)
    check((4, 4, 30, 32), max_block_rows=32)

    print("KERNEL_OK")
</pallas_src>

<mosaic_0001>
module attributes {stable_mosaic.version = 11 : i64} {
  func.func @kernel(%arg0: i32, %arg1: i32, %arg2: memref<16x128xf32, #tpu.memory_space<vmem>>, %arg3: memref<16x128xf32, #tpu.memory_space<vmem>>, %arg4: memref<1x8x128xf32, #tpu.memory_space<vmem>>) attributes {dimension_semantics = [#tpu.dimension_semantics<parallel>, #tpu.dimension_semantics<arbitrary>], iteration_bounds = array<i64: 1, 1>, scalar_prefetch = 0 : i64, scratch_operands = 0 : i64, tpu.core_type = #tpu.core_type<tc>, window_params = [{transform_indices = @transform_0, window_bounds = array<i64: 16, 128>}, {transform_indices = @transform_1, window_bounds = array<i64: 16, 128>}, {transform_indices = @transform_2, window_bounds = array<i64: 1, 8, 128>}]} {
    %c1_i32 = arith.constant 1 : i32
    %0 = arith.muli %arg0, %c1_i32 : i32
    %1 = arith.addi %0, %arg1 : i32
    %c0_i32 = arith.constant 0 : i32
    %2 = arith.cmpi eq, %arg1, %c0_i32 : i32
    %3 = arith.extui %2 : i1 to i32
    %c0_i32_0 = arith.constant 0 : i32
    %4 = arith.cmpi ne, %3, %c0_i32_0 : i32
    scf.if %4 {
      %cst = arith.constant 0.000000e+00 : f32
      %13 = vector.broadcast %cst : f32 to vector<8x128xf32>
      %c0 = arith.constant 0 : index
      %c0_5 = arith.constant 0 : index
      %c0_6 = arith.constant 0 : index
      %14 = vector.load %arg4[%c0, %c0_5, %c0_6] : memref<1x8x128xf32, #tpu.memory_space<vmem>>, vector<1x8x128xf32>
      %15 = vector.shape_cast %14 : vector<1x8x128xf32> to vector<8x128xf32>
      %16 = vector.shape_cast %13 : vector<8x128xf32> to vector<1x8x128xf32>
      tpu.vector_store %arg4[%c0, %c0_5, %c0_6], %16 {strides = array<i32>} : memref<1x8x128xf32, #tpu.memory_space<vmem>>, vector<1x8x128xf32>,
    } else {
    }
    %c1_i32_1 = arith.constant 1 : i32
    %5 = arith.addi %1, %c1_i32_1 : i32
    %c16_i32 = arith.constant 16 : i32
    %6 = arith.muli %5, %c16_i32 : i32
    %c16_i32_2 = arith.constant 16 : i32
    %7 = arith.cmpi sgt, %6, %c16_i32_2 : i32
    %true = arith.constant true
    %8 = arith.xori %7, %true : i1
    %9 = arith.extui %8 : i1 to i32
    %c0_i32_3 = arith.constant 0 : i32
    %10 = arith.cmpi ne, %9, %c0_i32_3 : i32
    scf.if %10 {
      %c0 = arith.constant 0 : index
      %c0_5 = arith.constant 0 : index
      %c0_6 = arith.constant 0 : index
      %13 = vector.load %arg4[%c0, %c0_5, %c0_6] : memref<1x8x128xf32, #tpu.memory_space<vmem>>, vector<1x8x128xf32>
      %14 = vector.shape_cast %13 : vector<1x8x128xf32> to vector<8x128xf32>
      %cst = arith.constant 0.000000e+00 : f32
      %15 = vector.broadcast %cst : f32 to vector<8x128xf32>
      %c0_i32_7 = arith.constant 0 : i32
      %c16_i32_8 = arith.constant 16 : i32
      %16 = arith.muli %c0_i32_7, %c16_i32_8 : i32
      %17 = tpu.assume_multiple %16, 16 : i32
      %18 = arith.index_cast %17 : i32 to index
      %c0_9 = arith.constant 0 : index
      %19 = vector.load %arg2[%18, %c0_9] : memref<16x128xf32, #tpu.memory_space<vmem>>, vector<16x128xf32>
      %20 = arith.index_cast %17 : i32 to index
      %c0_10 = arith.constant 0 : index
      %21 = vector.load %arg3[%20, %c0_10] : memref<16x128xf32, #tpu.memory_space<vmem>>, vector<16x128xf32>
      %cst_11 = arith.constant 0.000000e+00 : f32
      %22 = vector.broadcast %cst_11 : f32 to vector<16x128xf32>
      %23 = arith.maximumf %19, %22 : vector<16x128xf32>
      %24 = arith.mulf %19, %21 : vector<16x128xf32>
      %25 = arith.subf %23, %24 : vector<16x128xf32>
      %26 = math.absf %19 : vector<16x128xf32>
      %cst_12 = arith.constant 0.000000e+00 : f32
      %27 = vector.broadcast %cst_12 : f32 to vector<16x128xf32>
      %28 = arith.subf %27, %26 : vector<16x128xf32>
      %29 = math.exp %28 : vector<16x128xf32>
      %30 = math.log1p %29 : vector<16x128xf32>
      %31 = arith.addf %25, %30 : vector<16x128xf32>
      %32 = vector.shape_cast %31 : vector<16x128xf32> to vector<2x8x128xf32>
      %cst_13 = arith.constant dense<0.000000e+00> : vector<8x128xf32>
      %33 = vector.multi_reduction <add>, %32, %cst_13 [0] : vector<2x8x128xf32> to vector<8x128xf32>
      %34 = arith.addf %15, %33 : vector<8x128xf32>
      %c1_i32_14 = arith.constant 1 : i32
      %35 = arith.addf %14, %34 : vector<8x128xf32>
      %c0_15 = arith.constant 0 : index
      %c0_16 = arith.constant 0 : index
      %c0_17 = arith.constant 0 : index
      %36 = vector.load %arg4[%c0_15, %c0_16, %c0_17] : memref<1x8x128xf32, #tpu.memory_space<vmem>>, vector<1x8x128xf32>
      %37 = vector.shape_cast %36 : vector<1x8x128xf32> to vector<8x128xf32>
      %38 = vector.shape_cast %35 : vector<8x128xf32> to vector<1x8x128xf32>
      tpu.vector_store %arg4[%c0_15, %c0_16, %c0_17], %38 {strides = array<i32>} : memref<1x8x128xf32, #tpu.memory_space<vmem>>, vector<1x8x128xf32>,
    } else {
    }
    %11 = arith.extui %7 : i1 to i32
    %c0_i32_4 = arith.constant 0 : i32
    %12 = arith.cmpi ne, %11, %c0_i32_4 : i32
    scf.if %12 {
      %c0 = arith.constant 0 : index
      %c0_5 = arith.constant 0 : index
      %c0_6 = arith.constant 0 : index
      %13 = vector.load %arg4[%c0, %c0_5, %c0_6] : memref<1x8x128xf32, #tpu.memory_space<vmem>>, vector<1x8x128xf32>
      %14 = vector.shape_cast %13 : vector<1x8x128xf32> to vector<8x128xf32>
      %c16_i32_7 = arith.constant 16 : i32
      %15 = arith.muli %1, %c16_i32_7 : i32
      %c16_i32_8 = arith.constant 16 : i32
      %16 = arith.subi %c16_i32_8, %15 : i32
      %cst = arith.constant 0.000000e+00 : f32
      %17 = vector.broadcast %cst : f32 to vector<8x128xf32>
      %c0_i32_9 = arith.constant 0 : i32
      %c16_i32_10 = arith.constant 16 : i32
      %18 = arith.muli %c0_i32_9, %c16_i32_10 : i32
      %19 = tpu.assume_multiple %18, 16 : i32
      %20 = arith.index_cast %19 : i32 to index
      %c0_11 = arith.constant 0 : index
      %21 = vector.load %arg2[%20, %c0_11] : memref<16x128xf32, #tpu.memory_space<vmem>>, vector<16x128xf32>
      %22 = arith.index_cast %19 : i32 to index
      %c0_12 = arith.constant 0 : index
      %23 = vector.load %arg3[%22, %c0_12] : memref<16x128xf32, #tpu.memory_space<vmem>>, vector<16x128xf32>
      %cst_13 = arith.constant 0.000000e+00 : f32
      %24 = vector.broadcast %cst_13 : f32 to vector<16x128xf32>
      %25 = arith.maximumf %21, %24 : vector<16x128xf32>
      %26 = arith.mulf %21, %23 : vector<16x128xf32>
      %27 = arith.subf %25, %26 : vector<16x128xf32>
      %28 = math.absf %21 : vector<16x128xf32>
      %cst_14 = arith.constant 0.000000e+00 : f32
      %29 = vector.broadcast %cst_14 : f32 to vector<16x128xf32>
      %30 = arith.subf %29, %28 : vector<16x128xf32>
      %31 = math.exp %30 : vector<16x128xf32>
      %32 = math.log1p %31 : vector<16x128xf32>
      %33 = arith.addf %27, %32 : vector<16x128xf32>
      %34 = tpu.iota {dimensions = array<i32: 0>} : vector<16x128xi32>
      %35 = vector.broadcast %19 : i32 to vector<16x128xi32>
      %36 = arith.addi %34, %35 : vector<16x128xi32>
      %37 = vector.broadcast %16 : i32 to vector<16x128xi32>
      %38 = arith.cmpi slt, %36, %37 : vector<16x128xi32>
      %cst_15 = arith.constant 0.000000e+00 : f32
      %39 = vector.broadcast %cst_15 : f32 to vector<16x128xf32>
      %40 = arith.select %38, %33, %39 : vector<16x128xi1>, vector<16x128xf32>
      %41 = vector.shape_cast %40 : vector<16x128xf32> to vector<2x8x128xf32>
      %cst_16 = arith.constant dense<0.000000e+00> : vector<8x128xf32>
      %42 = vector.multi_reduction <add>, %41, %cst_16 [0] : vector<2x8x128xf32> to vector<8x128xf32>
      %43 = arith.addf %17, %42 : vector<8x128xf32>
      %c1_i32_17 = arith.constant 1 : i32
      %44 = arith.addf %14, %43 : vector<8x128xf32>
      %c0_18 = arith.constant 0 : index
      %c0_19 = arith.constant 0 : index
      %c0_20 = arith.constant 0 : index
      %45 = vector.load %arg4[%c0_18, %c0_19, %c0_20] : memref<1x8x128xf32, #tpu.memory_space<vmem>>, vector<1x8x128xf32>
      %46 = vector.shape_cast %45 : vector<1x8x128xf32> to vector<8x128xf32>
      %47 = vector.shape_cast %44 : vector<8x128xf32> to vector<1x8x128xf32>
      tpu.vector_store %arg4[%c0_18, %c0_19, %c0_20], %47 {strides = array<i32>} : memref<1x8x128xf32, #tpu.memory_space<vmem>>, vector<1x8x128xf32>,
    } else {
    }
    return
  }
  func.func @transform_0(%arg0: i32, %arg1: i32) -> (i32, i32) {
    %c1_i32 = arith.constant 1 : i32
    %0 = arith.muli %arg0, %c1_i32 : i32
    %1 = arith.addi %0, %arg1 : i32
    %c0_i32 = arith.constant 0 : i32
    %2 = arith.minsi %1, %c0_i32 : i32
    %c0_i32_0 = arith.constant 0 : i32
    %c0_i32_1 = arith.constant 0 : i32
    return %2, %c0_i32_0 : i32, i32
  }
  func.func @transform_1(%arg0: i32, %arg1: i32) -> (i32, i32) {
    %c1_i32 = arith.constant 1 : i32
    %0 = arith.muli %arg0, %c1_i32 : i32
    %1 = arith.addi %0, %arg1 : i32
    %c0_i32 = arith.constant 0 : i32
    %2 = arith.minsi %1, %c0_i32 : i32
    %c0_i32_0 = arith.constant 0 : i32
    %c0_i32_1 = arith.constant 0 : i32
    return %2, %c0_i32_0 : i32, i32
  }
  func.func @transform_2(%arg0: i32, %arg1: i32) -> (i32, i32, i32) {
    %c0_i32 = arith.constant 0 : i32
    %c0_i32_0 = arith.constant 0 : i32
    %c0_i32_1 = arith.constant 0 : i32
    return %arg0, %c0_i32, %c0_i32_0 : i32, i32, i32
  }
}

</mosaic_0001>

<bundles_post_ra>
// kernel: tpu_custom_call.1
= control target key start
LH: loop header
LB: loop body
LE: loop exit
PB: predicated region body
PF: predicated region fallthrough
CT: control target
= control target key end

     0   :  { %7 = vsyncpa [#allocation3], 0  ;;  %s304_s0 = inlined_call_operand.hbm [shape: f32[16,128], index: 0, kind: input, shape index: {}]   ;;  %s305_s1 = inlined_call_operand.hbm [shape: f32[16,128], index: 1, kind: input, shape index: {}]   ;;  %s306_s2 = inlined_call_operand.hbm [shape: f32[1,8,128], index: 2, kind: output, shape index: {}]  }
   0x1   :  { %8 = vsyncpa [#allocation6], 0 }
   0x2   :  { %9 = vsyncpa [#allocation4], 0  ;;  %s275_s9 = smov [#allocation2]  }
   0x3   :  { %s21_s10 = sshll.u32 %s275_s9, 4  ;;  %s22_s10 = int_to_ptr.vmem [resolvable:$true] %s21_s10 }
   0x4   :  { %s217_s11 = scalar_lea.vmem %s22_s10, 256  ;;  %p222_p1 = scmp.lt.s32.totalorder %s22_s10, %s22_s10 }
   0x5   :  { %p218_p0 = scmp.ne.s32.totalorder %s22_s10, %s217_s11  ;;  %p223_p2 = scmp.lt.s32.totalorder %s217_s11, %s217_s11 }
   0x7   :  { %p224_p3 = por %p223_p2, %p222_p1 }
   0x9   :  { %p225_p4 = pnand %p224_p3, %p218_p0 }
   0xb   :  { %228 = shalt.err (!%p225_p4)
}
   0xc   :  { %s276_s12 = smov 128   ;;  %s277_s13 = smov 8  }
   0xd   :  { %27 = dma.hbm_to_vmem [thread:$0]  %s304_s0, 256, %s22_s10, [#allocation3], %s276_s12, %s276_s12, %s277_s13  }
   0xe   :  { %s278_s16 = smov [#allocation5]  }
   0xf   :  { %s39_s17 = sshll.u32 %s278_s16, 4  ;;  %s40_s17 = int_to_ptr.vmem [resolvable:$true] %s39_s17 }
  0x10   :  { %s237_s18 = scalar_lea.vmem %s40_s17, 256  ;;  %p242_p6 = scmp.lt.s32.totalorder %s40_s17, %s40_s17 }
  0x11   :  { %p238_p5 = scmp.ne.s32.totalorder %s40_s17, %s237_s18  ;;  %p243_p7 = scmp.lt.s32.totalorder %s237_s18, %s237_s18 }
  0x13   :  { %p244_p8 = por %p243_p7, %p242_p6 }
  0x15   :  { %p245_p9 = pnand %p244_p8, %p238_p5 }
  0x17   :  { %248 = shalt.err (!%p245_p9)
}
  0x18   :  { %45 = dma.hbm_to_vmem [thread:$0]  %s305_s1, 256, %s40_s17, [#allocation6], %s276_s12, %s276_s12, %s277_s13  }
  0x19   :  { %269 = dma.done.wait [#allocation3], 256  }
  0x1a   :  { %270 = vsyncadd [#allocation3], 4294967040 }
  0x1b   :  { %271 = dma.done.wait [#allocation6], 256  }
  0x1c   :  { %272 = vsyncadd [#allocation6], 4294967040  ;;  %v74_v0 = vld [vmem:[#allocation2] sm:$0xff]  ;;  %v75_v1 = vld [vmem:[#allocation2 + $0x8] sm:$0xff]  ;;  %s279_s0 = smov [#allocation7]  }
  0x1d   :  { %v84_v2 = vand.u32 2147483647, %v74_v0  ;;  %v85_v3 = vand.u32 2147483647, %v75_v1  ;;  %v76_v14 = vld [vmem:[#allocation5] sm:$0xff]  ;;  %v77_v15 = vld [vmem:[#allocation5 + $0x8] sm:$0xff] }
  0x1e   :  { %v78_v17 = vmax.f32 %v74_v0, 0.0  ;;  %v80_v18 = vmul.f32 %v76_v14, %v74_v0  ;;  %v79_v21 = vmax.f32 %v75_v1, 0.0  ;;  %v81_v22 = vmul.f32 %v77_v15, %v75_v1  ;;  %s181_s1 = sshll.u32 %s279_s0, 4  ;;  %s182_s1 = int_to_ptr.vmem [resolvable:$true] %s181_s1 }
  0x1f   :  { %v86_v4 = vsub.f32 0.0, %v84_v2  ;;  %v87_v5 = vsub.f32 0.0, %v85_v3  ;;  %s249_s21 = scalar_lea.vmem %s182_s1, 128  ;;  %p254_p11 = scmp.lt.s32.totalorder %s182_s1, %s182_s1 }
  0x20   :  { %v82_v26 = vsub.f32 %v78_v17, %v80_v18  ;;  %v83_v29 = vsub.f32 %v79_v21, %v81_v22  ;;  %p250_p10 = scmp.ne.s32.totalorder %s182_s1, %s249_s21  ;;  %p255_p12 = scmp.lt.s32.totalorder %s249_s21, %s249_s21 }
  0x21   :  { %v88_v6 = vmul.f32 1.442695, %v86_v4  ;;  %v90_v7 = vmul.f32 1.442695, %v87_v5 }
  0x22   :  { %p256_p13 = por %p255_p12, %p254_p11 }
  0x23   :  { %201 = vpow2.f32 %v88_v6 }
  0x24   :  { %203 = vpow2.f32 %v90_v7  ;;  %p257_p0 = pnand %p256_p13, %p250_p10 }
  0x30   :  { %v202_v8 = vpop.eup %201 }
  0x31   :  { %v204_v9 = vpop.eup %203  ;;  %v92_v10 = vadd.f32 1.0, %v202_v8  ;;  %v95_v12 = vmul.f32 -0.5, %v202_v8  ;;  %v98_v19 = vand.u32 2147483647, %v202_v8 }
  0x32   :  { %v101_v11 = vadd.f32 1.0, %v204_v9  ;;  %v104_v13 = vmul.f32 -0.5, %v204_v9  ;;  %v107_v23 = vand.u32 2147483647, %v204_v9 }
  0x33   :  { %205 = vlog2.f32 %v92_v10  ;;  %v96_v16 = vadd.f32 1.0, %v95_v12  ;;  %vm99_vm0 = vcmp.lt.f32.partialorder %v98_v19, 0.0004427343 }
  0x34   :  { %207 = vlog2.f32 %v101_v11  ;;  %v105_v20 = vadd.f32 1.0, %v104_v13  ;;  %vm108_vm1 = vcmp.lt.f32.partialorder %v107_v23, 0.0004427343 }
  0x35   :  { %v97_v24 = vmul.f32 %v202_v8, %v96_v16 }
  0x36   :  { %v106_v27 = vmul.f32 %v204_v9, %v105_v20 }
  0x40   :  { %v206_v25 = vpop.eup %205 }
  0x41   :  { %v208_v28 = vpop.eup %207  ;;  %v94_v30 = vmul.f32 0.6931472, %v206_v25 }
  0x42   :  { %v103_v31 = vmul.f32 0.6931472, %v208_v28 }
  0x43   :  { %v100_v32 = vsel %vm99_vm0, %v97_v24, %v94_v30 }
  0x44   :  { %v109_v33 = vsel %vm108_vm1, %v106_v27, %v103_v31  ;;  %v110_v34 = vadd.f32 %v100_v32, %v82_v26 }
  0x45   :  { %v111_v35 = vadd.f32 %v109_v33, %v83_v29 }
  0x47   :  { %v112_v36 = vadd.f32 %v111_v35, %v110_v34 }
  0x49   :  { %115 = vst [vmem:[#allocation7] sm:$0xff] %v112_v36 }
  0x4a   :  { %260 = shalt.err (!%p257_p0)
}
  0x4b   :  { %184 = dma.vmem_to_hbm [thread:$0]  %s182_s1, 128, %s306_s2, [#allocation4]  }
  0x4c   :  { %273 = dma.done.wait [#allocation4], 128  }
  0x4d   :  { %274 = vsyncadd [#allocation4], 4294967168 }
  0x4e   :  { %188 = vsyncpa [#allocation3], 1 }
  0x4f   :  { %189 = vsyncpa [#allocation6], 1 }
  0x50   :  { %190 = vsyncpa [#allocation4], 1 }

</bundles_post_ra>
